<compile_context>
chip_gen: v7x
topology: tpu7x:2x2x1
jax: 0.10.0
libtpu: 0.0.40
codegen_flags: <defaults>
</compile_context>

<pallas_src>
import functools

import jax
import jax.numpy as jnp
from jax.experimental import pallas as pl
from jax.experimental.pallas import tpu as pltpu

_SUBLANES = 8
_LANES = 128


def asr_kernel(x_ref, w1_ref, b1_ref, w2_ref, b2_ref, logits_ref, acc_ref):
    """One (batch-tile i, K-tile k) grid step.

    x: (tm, tk) bf16, w1: (tk, H) bf16, b1: (1, H) f32,
    w2: (H, Cp) bf16,  b2: (1, Cp) f32,
    logits: (tm, Cp) f32 (lane-dense), acc: (tm, H) f32 VMEM scratch.
    """
    k = pl.program_id(1)

    @pl.when(k == 0)
    def _():
        acc_ref[...] = jnp.zeros_like(acc_ref)

    # Dominant matmul: bf16 x bf16 -> f32 accumulate on the MXU.
    acc_ref[...] += jnp.dot(x_ref[...], w1_ref[...],
                            preferred_element_type=jnp.float32)

    @pl.when(k == pl.num_programs(1) - 1)
    def _():
        h = jnp.maximum(acc_ref[...] + b1_ref[...], 0.0)      # f32 on VPU
        logits = jnp.dot(h.astype(jnp.bfloat16), w2_ref[...],
                         preferred_element_type=jnp.float32)
        logits_ref[...] = logits + b2_ref[...]                 # unmasked vst


def _round_up(x, m):
    return ((x + m - 1) // m) * m


def _pick_tile(total, cap, multiple):
    """Largest t <= cap that divides `total` and is a multiple of `multiple`
    (or equals the full extent)."""
    cap = min(cap, total)
    for t in range(cap, 0, -1):
        if total % t == 0 and (t % multiple == 0 or t == total):
            return t
    return total


def prepare_params(w1, b1, w2, b2):
    """One-time weight preparation (hoisted out of the per-call path)."""
    N, H = w1.shape
    C = w2.shape[1]
    Cp = _round_up(max(C, _LANES), _LANES)          # lane-dense class dim
    w1_b = jnp.asarray(w1, jnp.bfloat16)
    b1_r = jnp.asarray(b1, jnp.float32).reshape(1, H)
    w2_p = jnp.zeros((H, Cp), jnp.bfloat16).at[:, :C].set(
        jnp.asarray(w2, jnp.bfloat16))
    b2_p = jnp.zeros((1, Cp), jnp.float32).at[:, :C].set(
        jnp.asarray(b2, jnp.float32).reshape(1, C))
    return dict(w1=w1_b, b1=b1_r, w2=w2_p, b2=b2_p,
                num_frames=N, hidden=H, num_classes=C)


def speech_recognizer_forward(waveforms, params, *, max_tm=1024, max_tk=2048):
    """Batched forward. waveforms: (B, num_frames) float32.

    Returns (best_path[B] int32, logits[B, num_classes] float32).
    The original module's semantics correspond to B == 1 and best_path[0]
    (index into labels = ['N', 'O']).
    """
    B, N = waveforms.shape
    H = params["hidden"]
    C = params["num_classes"]
    assert N == params["num_frames"]
    w1_b, b1_r, w2_p, b2_p = (params["w1"], params["b1"],
                              params["w2"], params["b2"])
    Cp = w2_p.shape[1]

    # Sublane-fill the batch; skip the pad copy in the aligned common case.
    Bp = _round_up(max(B, _SUBLANES), _SUBLANES)
    x = waveforms.astype(jnp.bfloat16)
    if Bp != B:
        x = jnp.zeros((Bp, N), jnp.bfloat16).at[:B].set(x)

    # Tile sizes: largest exact divisors within caps sized for v7x's 64 MiB
    # VMEM (caps are generous; H=128 keeps the accumulator small).
    tm = _pick_tile(Bp, max_tm, _SUBLANES)
    tk = _pick_tile(N, max_tk, _LANES)
    grid = (Bp // tm, N // tk)

    # Explicit scoped-VMEM budget (double-buffered x/w1/out + acc + w2/b).
    est = (2 * tm * tk * 2 + 2 * tk * H * 2 + 2 * tm * Cp * 4
           + tm * H * 4 + H * Cp * 2 + (H + Cp) * 4)
    vmem_limit = int(min(48 * 1024 * 1024, max(16 * 1024 * 1024, 2 * est)))

    logits_p = pl.pallas_call(
        asr_kernel,
        out_shape=jax.ShapeDtypeStruct((Bp, Cp), jnp.float32),
        grid=grid,
        in_specs=[
            pl.BlockSpec((tm, tk), lambda i, k: (i, k)),   # x
            pl.BlockSpec((tk, H), lambda i, k: (k, 0)),    # W1
            pl.BlockSpec((1, H), lambda i, k: (0, 0)),     # b1 (resident)
            pl.BlockSpec((H, Cp), lambda i, k: (0, 0)),    # W2 (resident)
            pl.BlockSpec((1, Cp), lambda i, k: (0, 0)),    # b2 (resident)
        ],
        out_specs=pl.BlockSpec((tm, Cp), lambda i, k: (i, 0)),
        scratch_shapes=[pltpu.VMEM((tm, H), jnp.float32)],
        compiler_params=pltpu.CompilerParams(
            dimension_semantics=("parallel", "arbitrary"),
            vmem_limit_bytes=vmem_limit),
    )(x, w1_b, b1_r, w2_p, b2_p)

    logits = logits_p[:B, :C]
    # 2-wide argmax is free in XLA; avoids a 128-lane int32 kernel output.
    best_path = jnp.argmax(logits, axis=1).astype(jnp.int32)
    return best_path, logits


def reference_forward(waveforms, w1, b1, w2, b2):
    """Plain-JAX reference using the same bf16 casts as the kernel."""
    x = waveforms.astype(jnp.bfloat16)
    h = jnp.maximum(
        jnp.dot(x, w1.astype(jnp.bfloat16),
                preferred_element_type=jnp.float32)
        + b1.reshape(1, -1).astype(jnp.float32), 0.0)
    logits = jnp.dot(h.astype(jnp.bfloat16), w2.astype(jnp.bfloat16),
                     preferred_element_type=jnp.float32) + b2.reshape(1, -1)
    return jnp.argmax(logits, axis=1).astype(jnp.int32), logits


if __name__ == "__main__":
    num_frames = 256   # small synthetic waveform length
    hidden = 128
    num_classes = 2    # labels = ['N', 'O']

    key = jax.random.PRNGKey(0)
    k_x, k_w1, k_b1, k_w2, k_b2, k_x2 = jax.random.split(key, 6)

    w1 = jax.random.normal(k_w1, (num_frames, hidden), dtype=jnp.float32) * 0.05
    b1 = jax.random.normal(k_b1, (1, hidden), dtype=jnp.float32) * 0.01
    w2 = jax.random.normal(k_w2, (hidden, num_classes), dtype=jnp.float32) * 0.05
    b2 = jax.random.normal(k_b2, (1, num_classes), dtype=jnp.float32) * 0.01

    # One-time weight prep (cast/pad hoisted out of the per-call path).
    params = prepare_params(w1, b1, w2, b2)

    # Case 1: sublane-aligned batch, single resident block (grid (1, 1)).
    batch = 8
    waveforms = jax.random.normal(k_x, (batch, num_frames), dtype=jnp.float32)
    best_path, logits = speech_recognizer_forward(waveforms, params)
    best_path, logits = jax.block_until_ready((best_path, logits))
    ref_idx, ref_logits = reference_forward(waveforms, w1, b1, w2, b2)
    assert best_path.shape == (batch,)
    assert logits.shape == (batch, num_classes)
    assert jnp.allclose(logits, ref_logits, rtol=1e-2, atol=1e-2), "logits mismatch"
    assert jnp.array_equal(best_path, ref_idx), (
        f"argmax mismatch: {best_path} vs {ref_idx}")

    # Case 2: ragged batch + forced multi-step K grid (exercises the padded
    # batch path and the pl.when-accumulator reduction path).
    batch2 = 5
    waveforms2 = jax.random.normal(k_x2, (batch2, num_frames), dtype=jnp.float32)
    best_path2, logits2 = speech_recognizer_forward(
        waveforms2, params, max_tm=8, max_tk=128)
    best_path2, logits2 = jax.block_until_ready((best_path2, logits2))
    ref_idx2, ref_logits2 = reference_forward(waveforms2, w1, b1, w2, b2)
    assert best_path2.shape == (batch2,)
    assert logits2.shape == (batch2, num_classes)
    assert jnp.allclose(logits2, ref_logits2, rtol=1e-2, atol=1e-2), "logits mismatch (case 2)"
    assert jnp.array_equal(best_path2, ref_idx2), (
        f"argmax mismatch (case 2): {best_path2} vs {ref_idx2}")

    print("KERNEL_OK")
</pallas_src>

<mosaic_0001>
module attributes {stable_mosaic.version = 11 : i64} {
  func.func @asr_kernel(%arg0: i32, %arg1: i32, %arg2: memref<8x256xbf16, #tpu.memory_space<vmem>>, %arg3: memref<256x128xbf16, #tpu.memory_space<vmem>>, %arg4: memref<1x128xf32, #tpu.memory_space<vmem>>, %arg5: memref<128x128xbf16, #tpu.memory_space<vmem>>, %arg6: memref<1x128xf32, #tpu.memory_space<vmem>>, %arg7: memref<8x128xf32, #tpu.memory_space<vmem>>, %arg8: memref<8x128xf32, #tpu.memory_space<vmem>>) attributes {dimension_semantics = [#tpu.dimension_semantics<parallel>, #tpu.dimension_semantics<arbitrary>], iteration_bounds = array<i64: 1, 1>, scalar_prefetch = 0 : i64, scratch_operands = 1 : i64, tpu.core_type = #tpu.core_type<tc>, window_params = [{transform_indices = @transform_0, window_bounds = array<i64: 8, 256>}, {transform_indices = @transform_1, window_bounds = array<i64: 256, 128>}, {pipeline_mode = #tpu.pipeline_mode<synchronous>, transform_indices = @transform_2, window_bounds = array<i64: 1, 128>}, {pipeline_mode = #tpu.pipeline_mode<synchronous>, transform_indices = @transform_3, window_bounds = array<i64: 128, 128>}, {pipeline_mode = #tpu.pipeline_mode<synchronous>, transform_indices = @transform_4, window_bounds = array<i64: 1, 128>}, {transform_indices = @transform_5, window_bounds = array<i64: 8, 128>}]} {
    %c0_i32 = arith.constant 0 : i32
    %0 = arith.cmpi eq, %arg1, %c0_i32 : i32
    %1 = arith.extui %0 : i1 to i32
    %c0_i32_0 = arith.constant 0 : i32
    %2 = arith.cmpi ne, %1, %c0_i32_0 : i32
    scf.if %2 {
      %cst_10 = arith.constant 0.000000e+00 : f32
      %12 = vector.broadcast %cst_10 : f32 to vector<8x128xf32>
      %c0_11 = arith.constant 0 : index
      %c0_12 = arith.constant 0 : index
      %13 = vector.load %arg8[%c0_11, %c0_12] : memref<8x128xf32, #tpu.memory_space<vmem>>, vector<8x128xf32>
      tpu.vector_store %arg8[%c0_11, %c0_12], %12 {strides = array<i32>} : memref<8x128xf32, #tpu.memory_space<vmem>>, vector<8x128xf32>,
    } else {
    }
    %c0 = arith.constant 0 : index
    %c0_1 = arith.constant 0 : index
    %3 = vector.load %arg8[%c0, %c0_1] : memref<8x128xf32, #tpu.memory_space<vmem>>, vector<8x128xf32>
    %c0_2 = arith.constant 0 : index
    %c0_3 = arith.constant 0 : index
    %4 = vector.load %arg2[%c0_2, %c0_3] : memref<8x256xbf16, #tpu.memory_space<vmem>>, vector<8x256xbf16>
    %c0_4 = arith.constant 0 : index
    %c0_5 = arith.constant 0 : index
    %5 = vector.load %arg3[%c0_4, %c0_5] : memref<256x128xbf16, #tpu.memory_space<vmem>>, vector<256x128xbf16>
    %cst = arith.constant dense<0.000000e+00> : vector<8x128xf32>
    %6 = tpu.matmul %4, %5, %cst {dimension_numbers = #tpu.dot_dimension_numbers<[1], [0], [0], [1], [0, 0, 1, 1], [], []>} : vector<8x256xbf16>, vector<256x128xbf16>, vector<8x128xf32> -> vector<8x128xf32>
    %7 = arith.addf %3, %6 : vector<8x128xf32>
    %c0_6 = arith.constant 0 : index
    %c0_7 = arith.constant 0 : index
    %8 = vector.load %arg8[%c0_6, %c0_7] : memref<8x128xf32, #tpu.memory_space<vmem>>, vector<8x128xf32>
    tpu.vector_store %arg8[%c0_6, %c0_7], %7 {strides = array<i32>} : memref<8x128xf32, #tpu.memory_space<vmem>>, vector<8x128xf32>,
    %c0_i32_8 = arith.constant 0 : i32
    %9 = arith.cmpi eq, %arg1, %c0_i32_8 : i32
    %10 = arith.extui %9 : i1 to i32
    %c0_i32_9 = arith.constant 0 : i32
    %11 = arith.cmpi ne, %10, %c0_i32_9 : i32
    scf.if %11 {
      %c0_10 = arith.constant 0 : index
      %c0_11 = arith.constant 0 : index
      %12 = vector.load %arg8[%c0_10, %c0_11] : memref<8x128xf32, #tpu.memory_space<vmem>>, vector<8x128xf32>
      %c0_12 = arith.constant 0 : index
      %c0_13 = arith.constant 0 : index
      %13 = vector.load %arg4[%c0_12, %c0_13] : memref<1x128xf32, #tpu.memory_space<vmem>>, vector<1x128xf32>
      %14 = vector.broadcast %13 : vector<1x128xf32> to vector<8x128xf32>
      %15 = arith.addf %12, %14 : vector<8x128xf32>
      %cst_14 = arith.constant 0.000000e+00 : f32
      %16 = vector.broadcast %cst_14 : f32 to vector<8x128xf32>
      %17 = arith.maximumf %15, %16 : vector<8x128xf32>
      %18 = arith.truncf %17 : vector<8x128xf32> to vector<8x128xbf16>
      %c0_15 = arith.constant 0 : index
      %c0_16 = arith.constant 0 : index
      %19 = vector.load %arg5[%c0_15, %c0_16] : memref<128x128xbf16, #tpu.memory_space<vmem>>, vector<128x128xbf16>
      %cst_17 = arith.constant dense<0.000000e+00> : vector<8x128xf32>
      %20 = tpu.matmul %18, %19, %cst_17 {dimension_numbers = #tpu.dot_dimension_numbers<[1], [0], [0], [1], [0, 0, 1, 1], [], []>} : vector<8x128xbf16>, vector<128x128xbf16>, vector<8x128xf32> -> vector<8x128xf32>
      %c0_18 = arith.constant 0 : index
      %c0_19 = arith.constant 0 : index
      %21 = vector.load %arg6[%c0_18, %c0_19] : memref<1x128xf32, #tpu.memory_space<vmem>>, vector<1x128xf32>
      %22 = vector.broadcast %21 : vector<1x128xf32> to vector<8x128xf32>
      %23 = arith.addf %20, %22 : vector<8x128xf32>
      %c0_20 = arith.constant 0 : index
      %c0_21 = arith.constant 0 : index
      %24 = vector.load %arg7[%c0_20, %c0_21] : memref<8x128xf32, #tpu.memory_space<vmem>>, vector<8x128xf32>
      tpu.vector_store %arg7[%c0_20, %c0_21], %23 {strides = array<i32>} : memref<8x128xf32, #tpu.memory_space<vmem>>, vector<8x128xf32>,
    } else {
    }
    return
  }
  func.func @transform_0(%arg0: i32, %arg1: i32) -> (i32, i32) {
    %c0_i32 = arith.constant 0 : i32
    return %arg0, %arg1 : i32, i32
  }
  func.func @transform_1(%arg0: i32, %arg1: i32) -> (i32, i32) {
    %c0_i32 = arith.constant 0 : i32
    %c0_i32_0 = arith.constant 0 : i32
    return %arg1, %c0_i32 : i32, i32
  }
  func.func @transform_2(%arg0: i32, %arg1: i32) -> (i32, i32) {
    %c0_i32 = arith.constant 0 : i32
    %c0_i32_0 = arith.constant 0 : i32
    %c0_i32_1 = arith.constant 0 : i32
    return %c0_i32, %c0_i32_0 : i32, i32
  }
  func.func @transform_3(%arg0: i32, %arg1: i32) -> (i32, i32) {
    %c0_i32 = arith.constant 0 : i32
    %c0_i32_0 = arith.constant 0 : i32
    %c0_i32_1 = arith.constant 0 : i32
    return %c0_i32, %c0_i32_0 : i32, i32
  }
  func.func @transform_4(%arg0: i32, %arg1: i32) -> (i32, i32) {
    %c0_i32 = arith.constant 0 : i32
    %c0_i32_0 = arith.constant 0 : i32
    %c0_i32_1 = arith.constant 0 : i32
    return %c0_i32, %c0_i32_0 : i32, i32
  }
  func.func @transform_5(%arg0: i32, %arg1: i32) -> (i32, i32) {
    %c0_i32 = arith.constant 0 : i32
    %c0_i32_0 = arith.constant 0 : i32
    return %arg0, %c0_i32 : i32, i32
  }
}

</mosaic_0001>

<bundles_post_ra>
// kernel: tpu_custom_call.1
= control target key start
LH: loop header
LB: loop body
LE: loop exit
PB: predicated region body
PF: predicated region fallthrough
CT: control target
= control target key end

     0   :  { %10 = vsyncpa [#allocation4], 0  ;;  %s701_s0 = inlined_call_operand.hbm [shape: bf16[8,256], index: 0, kind: input, shape index: {}]   ;;  %s702_s1 = inlined_call_operand.hbm [shape: bf16[256,128], index: 1, kind: input, shape index: {}]   ;;  %s703_s2 = inlined_call_operand.vmem [shape: f32[1,128], index: 2, kind: input, shape index: {}]   ;;  %s704_s3 = inlined_call_operand.hbm [shape: bf16[128,128], index: 3, kind: input, shape index: {}]   ;;  %s705_s4 = inlined_call_operand.vmem [shape: f32[1,128], index: 4, kind: input, shape index: {}]   ;;  %s706_s5 = inlined_call_operand.hbm [shape: f32[8,128], index: 5, kind: output, shape index: {}]  }
   0x1   :  { %11 = vsyncpa [#allocation7], 0 }
   0x2   :  { %12 = vsyncpa [#allocation5], 0  ;;  %s594_s18 = smov [#allocation6]   ;;  %s500_s22 = scalar_lea.hbm %s702_s1, 2048 }
   0x3   :  { %s28_s19 = sshll.u32 %s594_s18, 4  ;;  %p501_p0 = scmp.ne.s32.totalorder %s702_s1, %s500_s22  ;;  %s29_s19 = int_to_ptr.vmem [resolvable:$true] %s28_s19 }
   0x4   :  { %p504_p1 = scmp.lt.u32.totalorder %s500_s22, %s702_s1 }
   0x6   :  { %p506_p2 = pnand %p504_p1, %p501_p0 }
   0x8   :  { %509 = shalt.err (!%p506_p2)
}
   0x9   :  { %s510_s27 = scalar_lea.vmem %s29_s19, 2048  ;;  %p515_p4 = scmp.lt.s32.totalorder %s29_s19, %s29_s19 }
   0xa   :  { %p511_p3 = scmp.ne.s32.totalorder %s29_s19, %s510_s27  ;;  %p516_p5 = scmp.lt.s32.totalorder %s510_s27, %s510_s27 }
   0xc   :  { %p517_p6 = por %p516_p5, %p515_p4 }
   0xe   :  { %p518_p7 = pnand %p517_p6, %p511_p3 }
  0x10   :  { %521 = shalt.err (!%p518_p7)
}
  0x11   :  { %s595_s28 = smov 64   ;;  %s596_s29 = smov 4  }
  0x12   :  { %34 = dma.hbm_to_vmem [thread:$0]  %s702_s1, 2048, %s29_s19, [#allocation7], %s595_s28, %s595_s28, %s596_s29  }
  0x13   :  { %s597_s7 = smov [#allocation3]   ;;  %s598_s9 = smov [#allocation8]  }
  0x14   :  { %s19_s8 = sshll.u32 %s597_s7, 4  ;;  %s42_s10 = sshll.u32 %s598_s9, 4  ;;  %s20_s8 = int_to_ptr.vmem [resolvable:$true] %s19_s8  ;;  %s43_s10 = int_to_ptr.vmem [resolvable:$true] %s42_s10 }
  0x15   :  { %s522_s13 = scalar_lea.hbm %s701_s0, 128 }
  0x16   :  { %p523_p8 = scmp.ne.s32.totalorder %s701_s0, %s522_s13  ;;  %p526_p9 = scmp.lt.u32.totalorder %s522_s13, %s701_s0 }
  0x18   :  { %p528_p10 = pnand %p526_p9, %p523_p8 }
  0x1a   :  { %531 = shalt.err (!%p528_p10)
}
  0x1b   :  { %s532_s1 = scalar_lea.vmem %s20_s8, 128  ;;  %p537_p12 = scmp.lt.s32.totalorder %s20_s8, %s20_s8 }
  0x1c   :  { %p533_p11 = scmp.ne.s32.totalorder %s20_s8, %s532_s1  ;;  %p538_p13 = scmp.lt.s32.totalorder %s532_s1, %s532_s1 }
  0x1e   :  { %p539_p0 = por %p538_p13, %p537_p12 }
  0x20   :  { %p540_p1 = pnand %p539_p0, %p533_p11 }
  0x22   :  { %543 = shalt.err (!%p540_p1)
}
  0x23   :  { %22 = dma.hbm_to_vmem [thread:$0]  %s701_s0, 128, %s20_s8, [#allocation4]  }
  0x24   :  { %s544_s22 = scalar_lea.hbm %s704_s3, 1024 }
  0x25   :  { %p545_p2 = scmp.ne.s32.totalorder %s704_s3, %s544_s22  ;;  %p548_p3 = scmp.lt.u32.totalorder %s544_s22, %s704_s3 }
  0x27   :  { %p550_p4 = pnand %p548_p3, %p545_p2 }
  0x29   :  { %553 = shalt.err (!%p550_p4)
}
  0x2a   :  { %s554_s27 = scalar_lea.vmem %s43_s10, 1024  ;;  %p559_p6 = scmp.lt.s32.totalorder %s43_s10, %s43_s10 }
  0x2b   :  { %p555_p5 = scmp.ne.s32.totalorder %s43_s10, %s554_s27  ;;  %p560_p7 = scmp.lt.s32.totalorder %s554_s27, %s554_s27 }
  0x2d   :  { %p561_p8 = por %p560_p7, %p559_p6 }
  0x2f   :  { %p562_p9 = pnand %p561_p8, %p555_p5 }
  0x31   :  { %565 = shalt.err (!%p562_p9)
}
  0x32   :  { %48 = dma.hbm_to_vmem [thread:$0]  %s704_s3, 1024, %s43_s10, [#allocation7], %s595_s28, %s595_s28, %s596_s29  }
  0x33   :  { %588 = dma.done.wait [#allocation4], 128  }
  0x34   :  { %589 = vsyncadd [#allocation4], 4294967168 }
  0x35   :  { %590 = dma.done.wait [#allocation7], 3072  }
  0x36   :  { %591 = vsyncadd [#allocation7], 4294964224  ;;  %v599_v0 = vmov 0.0   ;;  %v474_v1 = vld [vmem:[#allocation6 + $0x40] sm:$0xff]   ;;  %v476_v3 = vld [vmem:[#allocation6 + $0x48] sm:$0xff]   ;;  %vm600_vm0 = vmmov 0  }
  0x37   :  { %446 = vmatprep.subr.bf16.mxu1 %v599_v0  ;;  %v475_v2 = vld [vmem:[#allocation6] sm:$0xff]   ;;  %415 = vmatprep.subr.bf16.mxu0 %v474_v1  ;;  %v477_v4 = vld [vmem:[#allocation6 + $0x8] sm:$0xff]   ;;  %v478_v5 = vld [vmem:[#allocation6 + $0x50] sm:$0xff]   ;;  %s601_s7 = smov [#allocation9]  }
  0x38   :  { %416 = vmatpush3.bf16.msra.mxu0 %v475_v2  ;;  %v479_v6 = vld [vmem:[#allocation6 + $0x10] sm:$0xff]   ;;  %v480_v7 = vld [vmem:[#allocation6 + $0x58] sm:$0xff]   ;;  %v482_v9 = vld [vmem:[#allocation6 + $0x60] sm:$0xff]   ;;  %462 = vmatprep.mubr.msk.bf16.mxu1 %vm600_vm0, %v599_v0  ;;  %s377_s8 = sshll.u32 %s601_s7, 4  ;;  %s378_s8 = int_to_ptr.vmem [resolvable:$true] %s377_s8 }
  0x39   :  { %417 = vmatprep.subr.bf16.mxu0 %v476_v3  ;;  %v481_v8 = vld [vmem:[#allocation6 + $0x18] sm:$0xff]   ;;  %v483_v10 = vld [vmem:[#allocation6 + $0x20] sm:$0xff]   ;;  %v484_v11 = vld [vmem:[#allocation6 + $0x68] sm:$0xff]   ;;  %p571_p11 = scmp.lt.s32.totalorder %s378_s8, %s378_s8 }
  0x3a   :  { %v67_v12 = vld [vmem:[#allocation3] sm:$0xff]  ;;  %v492_v14 = vld [vmem:[#allocation8] sm:$0xff]   ;;  %v485_v15 = vld [vmem:[#allocation6 + $0x28] sm:$0xff]  }
  0x3b   :  { %v388_v13 = vcombine.high %v67_v12, %v67_v12  ;;  %v486_v16 = vld [vmem:[#allocation6 + $0x70] sm:$0xff]   ;;  %447 = vmatpush3.bf16.msra.mxu1 %v492_v14  ;;  %v493_v17 = vld [vmem:[#allocation8 + $0x8] sm:$0xff]   ;;  %v488_v19 = vld [vmem:[#allocation6 + $0x78] sm:$0xff]   ;;  %v387_v23 = vcombine.low %v67_v12, %v67_v12 }
  0x3c   :  { %418 = vmatpush3.bf16.msra.mxu0 %v477_v4  ;;  %448 = vmatprep.subr.bf16.mxu1 %v599_v0  ;;  %v487_v18 = vld [vmem:[#allocation6 + $0x30] sm:$0xff]   ;;  %v489_v21 = vld [vmem:[#allocation6 + $0x38] sm:$0xff]   ;;  %v496_v24 = vld [vmem:[#allocation8 + $0x20] sm:$0xff]  }
  0x3d   :  { %419 = vmatprep.subr.bf16.mxu0 %v478_v5  ;;  %235 = vmatprep.mubr.bf16.mxu0 %v388_v13  ;;  %v494_v20 = vld [vmem:[#allocation8 + $0x10] sm:$0xff]   ;;  %v495_v22 = vld [vmem:[#allocation8 + $0x18] sm:$0xff]   ;;  %v497_v25 = vld [vmem:[#allocation8 + $0x28] sm:$0xff]  }
  0x3e   :  { %v498_v26 = vld [vmem:[#allocation8 + $0x30] sm:$0xff]   ;;  %v499_v27 = vld [vmem:[#allocation8 + $0x38] sm:$0xff]  }
  0x3f   :  { %449 = vmatpush3.bf16.msra.mxu1 %v493_v17  ;;  %v405_v30 = vld [vmem:[%s703_s2] ss:$0 sm:$0xff]  ;;  %s566_s2 = scalar_lea.vmem %s378_s8, 128 }
  0x40   :  { %420 = vmatpush3.bf16.msra.mxu0 %v479_v6  ;;  %450 = vmatprep.subr.bf16.mxu1 %v599_v0  ;;  %v406_v37 = vld [vmem:[%s705_s4] ss:$0 sm:$0xff]  ;;  %p567_p10 = scmp.ne.s32.totalorder %s378_s8, %s566_s2  ;;  %p572_p12 = scmp.lt.s32.totalorder %s566_s2, %s566_s2 }
  0x41   :  { %421 = vmatprep.subr.bf16.mxu0 %v480_v7 }
  0x42   :  { %p573_p13 = por %p572_p12, %p571_p11 }
  0x43   :  { %451 = vmatpush3.bf16.msra.mxu1 %v494_v20 }
  0x44   :  { %422 = vmatpush3.bf16.msra.mxu0 %v481_v8  ;;  %452 = vmatprep.subr.bf16.mxu1 %v599_v0  ;;  %p574_p0 = pnand %p573_p13, %p567_p10 }
  0x45   :  { %423 = vmatprep.subr.bf16.mxu0 %v482_v9 }
  0x47   :  { %453 = vmatpush3.bf16.msra.mxu1 %v495_v22 }
  0x48   :  { %424 = vmatpush3.bf16.msra.mxu0 %v483_v10  ;;  %454 = vmatprep.subr.bf16.mxu1 %v599_v0 }
  0x49   :  { %425 = vmatprep.subr.bf16.mxu0 %v484_v11 }
  0x4b   :  { %455 = vmatpush3.bf16.msra.mxu1 %v496_v24 }
  0x4c   :  { %426 = vmatpush3.bf16.msra.mxu0 %v485_v15  ;;  %456 = vmatprep.subr.bf16.mxu1 %v599_v0 }
  0x4d   :  { %427 = vmatprep.subr.bf16.mxu0 %v486_v16 }
  0x4f   :  { %457 = vmatpush3.bf16.msra.mxu1 %v497_v25 }
  0x50   :  { %428 = vmatpush3.bf16.msra.mxu0 %v487_v18  ;;  %458 = vmatprep.subr.bf16.mxu1 %v599_v0 }
  0x51   :  { %429 = vmatprep.subr.bf16.mxu0 %v488_v19 }
  0x53   :  { %459 = vmatpush3.bf16.msra.mxu1 %v498_v26 }
  0x54   :  { %430 = vmatpush3.bf16.msra.mxu0 %v489_v21  ;;  %460 = vmatprep.subr.bf16.mxu1 %v599_v0 }
  0x57   :  { %236 = vmatmul.mubr.bf16.vlgmr.msra.gmra.mrb[0].mxu0 %v387_v23  ;;  %461 = vmatpush3.bf16.msra.mxu1 %v499_v27 }
 0x12a   :  { %v431_v28 = vpop.f32.mrb[0].mxu0 }
 0x12b   :  { %v432_v29 = vpop.f32.mrb[1].mxu0 }
 0x12c   :  { %v433_v31 = vadd.f32 %v432_v29, %v431_v28  ;;  %v434_v32 = vpop.f32.mrb[2].mxu0 }
 0x12d   :  { %v435_v33 = vpop.f32.mrb[3].mxu0 }
 0x12e   :  { %v256_v34 = vadd.f32 %v433_v31, %v405_v30 }
 0x130   :  { %v257_v35 = vmax.f32 %v256_v34, 0.0 }
 0x132   :  { %v258_v36 = vpack.c.bf16 %v257_v35, %v257_v35 }
 0x134   :  { %463 = vmatmul.mubr.bf16.vlgmr.msra.gmra.mrb[0].mxu1 %v258_v36 }
 0x207   :  { %v364_v38 = vpop.f32.mrb[0].mxu1 }
 0x208   :  { %v365_v39 = vadd.f32 %v406_v37, %v364_v38  ;;  %v464_v40 = vpop.f32.mrb[1].mxu1 }
 0x209   :  { %v367_v41 = vpop.f32.mrb[2].mxu1 }
 0x20a   :  { %370 = vst [vmem:[#allocation9] sm:$0xff] %v365_v39  ;;  %v465_v42 = vpop.f32.mrb[3].mxu1 }
 0x20b   :  { %577 = shalt.err (!%p574_p0)
}
 0x20c   :  { %s578_s4 = scalar_lea.hbm %s706_s5, 128 }
 0x20d   :  { %p579_p1 = scmp.ne.s32.totalorder %s706_s5, %s578_s4  ;;  %p582_p2 = scmp.lt.u32.totalorder %s578_s4, %s706_s5 }
 0x20f   :  { %p584_p3 = pnand %p582_p2, %p579_p1 }
 0x211   :  { %587 = shalt.err (!%p584_p3)
}
 0x212   :  { %380 = dma.vmem_to_hbm [thread:$0]  %s378_s8, 128, %s706_s5, [#allocation5]  }
 0x213   :  { %592 = dma.done.wait [#allocation5], 128  }
 0x214   :  { %593 = vsyncadd [#allocation5], 4294967168 }
 0x215   :  { %384 = vsyncpa [#allocation4], 1 }
 0x216   :  { %385 = vsyncpa [#allocation7], 1 }
 0x217   :  { %386 = vsyncpa [#allocation5], 1 }

</bundles_post_ra>
